<compile_context>
chip_gen: v7x
topology: tpu7x:2x2x1
jax: 0.10.0
libtpu: 0.0.40
codegen_flags: <defaults>
</compile_context>

<pallas_src>
import jax
import jax.numpy as jnp
from jax.experimental import pallas as pl
from jax.experimental.pallas import tpu as pltpu


# Transpose-RHS contraction: (1, K) x (TB, K) -> (1, TB).  Same dimension numbers the
# official Pallas TPU flash-attention kernel uses for q @ k.T.
_NT_DIMS = (((1,), (1,)), ((), ()))


def ids_mlp_kernel(x_ref, w1_ref, b1_ref, w2_ref, b2_ref, w3_ref, b3_ref, o_ref):
    """One batch tile of the 78 -> 50 -> 25 -> 1 MLP.

    x_ref : (TB, 78) bf16   batch tile streamed from HBM
    w*_ref: bf16 weights    resident across the whole grid (constant index_maps)
    b*_ref: f32 biases
    o_ref : (1, 1, TB) f32  batch-on-lanes -> lane-dense stores
    """
    # Layer 1: bf16 x bf16 MXU matmul, f32 accumulation.
    h1 = jnp.dot(x_ref[...], w1_ref[...], preferred_element_type=jnp.float32)
    h1 = jnp.maximum(h1 + b1_ref[...], 0.0)                          # (TB, 50) f32

    # Layer 2: keep the activation in f32 (kernel is HBM-bound, not compute-bound).
    h2 = jnp.dot(h1, w2_ref[...].astype(jnp.float32),
                 preferred_element_type=jnp.float32)
    h2 = jnp.maximum(h2 + b2_ref[...], 0.0)                          # (TB, 25) f32

    # Layer 3: (1, 25) . (TB, 25)^T -> (1, TB).  Lands the per-row scalar batch-on-lanes
    # so the output store is lane-dense (unmasked full-width vst).
    out = jax.lax.dot_general(
        w3_ref[...].astype(jnp.float32), h2,
        dimension_numbers=_NT_DIMS,
        preferred_element_type=jnp.float32)                          # (1, TB)
    out = out + b3_ref[...]                                          # + (1,1) bias
    o_ref[0] = out.astype(o_ref.dtype)                               # -> (1, 1, TB) block


def _round_up(n, m):
    return ((n + m - 1) // m) * m


def ids_model_forward(x, params, tile_b=1024):
    """x: (B, 78) float32. params: w1,b1,w2,b2,w3,b3 with weights stored (in, out)."""
    B, F = x.shape

    # Batch tile: multiple of 128 (lane-dense output) and of bf16 sublane packing (16).
    # At TB=1024: 2 buffers x (1024x78 bf16) + f32 intermediates << 1 MiB, safe on
    # v7x's 32 MiB default scoped VMEM as well as v5e/v6e.
    TB = min(int(tile_b), _round_up(B, 128))
    B_pad = _round_up(B, TB)
    G = B_pad // TB

    if B_pad != B:
        x = jnp.pad(x, ((0, B_pad - B), (0, 0)))

    # bf16 halves the HBM traffic of the dominant x stream; accumulation stays f32.
    x_bf = x.astype(jnp.bfloat16)
    w1 = params["w1"].astype(jnp.bfloat16)                     # (78, 50)
    w2 = params["w2"].astype(jnp.bfloat16)                     # (50, 25)
    w3 = params["w3"].reshape(1, -1).astype(jnp.bfloat16)      # (1, 25) row vector
    b1 = params["b1"].astype(jnp.float32)                      # (1, 50)
    b2 = params["b2"].astype(jnp.float32)                      # (1, 25)
    b3 = params["b3"].reshape(1, 1).astype(jnp.float32)        # (1, 1)

    def full_const(a):
        # Full-array block, same block index every grid step -> stays resident in VMEM.
        return pl.BlockSpec(a.shape, lambda i, _nd=a.ndim: (0,) * _nd)

    out = pl.pallas_call(
        ids_mlp_kernel,
        out_shape=jax.ShapeDtypeStruct((G, 1, TB), jnp.float32),
        grid_spec=pltpu.PrefetchScalarGridSpec(
            num_scalar_prefetch=0,
            grid=(G,),
            in_specs=[
                pl.BlockSpec((TB, F), lambda i: (i, 0)),       # x: streamed per batch tile
                full_const(w1), full_const(b1),                # weights/biases: resident
                full_const(w2), full_const(b2),
                full_const(w3), full_const(b3),
            ],
            out_specs=pl.BlockSpec((1, 1, TB), lambda i: (i, 0, 0)),
        ),
        compiler_params=pltpu.CompilerParams(
            dimension_semantics=("parallel",),  # shard batch tiles across TCs on v7x
        ),
    )(x_bf, w1, b1, w2, b2, w3, b3)

    return out.reshape(B_pad, 1)[:B]


def init_params(key):
    """Deterministic init mimicking PyTorch nn.Linear default (U[-1/sqrt(fan_in), ...])."""
    dims = [(78, 50), (50, 25), (25, 1)]
    params = {}
    for i, (fan_in, fan_out) in enumerate(dims, start=1):
        key, kw, kb = jax.random.split(key, 3)
        bound = 1.0 / jnp.sqrt(float(fan_in))
        params[f"w{i}"] = jax.random.uniform(
            kw, (fan_in, fan_out), jnp.float32, minval=-bound, maxval=bound)
        params[f"b{i}"] = jax.random.uniform(
            kb, (1, fan_out), jnp.float32, minval=-bound, maxval=bound)
    return params


def reference_forward(x, p):
    # f32 math on the same bf16-rounded x / weights the kernel consumes.
    q = lambda a: a.astype(jnp.bfloat16).astype(jnp.float32)
    h1 = jnp.maximum(q(x) @ q(p["w1"]) + p["b1"], 0.0)
    h2 = jnp.maximum(h1 @ q(p["w2"]) + p["b2"], 0.0)
    return h2 @ q(p["w3"]) + p["b3"]


if __name__ == "__main__":
    key = jax.random.PRNGKey(0)
    kx, kx2, kp = jax.random.split(key, 3)
    params = init_params(kp)

    # Small demo batch (single tile, padded to 128 rows inside the wrapper).
    x = jax.random.normal(kx, (8, 78), dtype=jnp.float32)
    out = jax.block_until_ready(ids_model_forward(x, params))
    ref = reference_forward(x, params)
    assert out.shape == (8, 1), out.shape
    assert jnp.allclose(out, ref, atol=1e-3, rtol=1e-3), "mismatch vs reference (small batch)"

    # Exercise the multi-tile pipelined path (grid > 1) with a padded tail tile.
    x2 = jax.random.normal(kx2, (300, 78), dtype=jnp.float32)
    out2 = jax.block_until_ready(ids_model_forward(x2, params, tile_b=128))
    ref2 = reference_forward(x2, params)
    assert out2.shape == (300, 1), out2.shape
    assert jnp.allclose(out2, ref2, atol=1e-3, rtol=1e-3), "mismatch vs reference (multi tile)"

    print("KERNEL_OK")
</pallas_src>

<mosaic_0001>
module attributes {stable_mosaic.version = 11 : i64} {
  func.func @ids_mlp_kernel(%arg0: i32, %arg1: memref<128x78xbf16, #tpu.memory_space<vmem>>, %arg2: memref<78x50xbf16, #tpu.memory_space<vmem>>, %arg3: memref<1x50xf32, #tpu.memory_space<vmem>>, %arg4: memref<50x25xbf16, #tpu.memory_space<vmem>>, %arg5: memref<1x25xf32, #tpu.memory_space<vmem>>, %arg6: memref<1x25xbf16, #tpu.memory_space<vmem>>, %arg7: memref<1x1xf32, #tpu.memory_space<vmem>>, %arg8: memref<1x1x128xf32, #tpu.memory_space<vmem>>) attributes {dimension_semantics = [#tpu.dimension_semantics<parallel>], iteration_bounds = array<i64: 1>, scalar_prefetch = 0 : i64, scratch_operands = 0 : i64, tpu.core_type = #tpu.core_type<tc>, window_params = [{transform_indices = @transform_0, window_bounds = array<i64: 128, 78>}, {pipeline_mode = #tpu.pipeline_mode<synchronous>, transform_indices = @transform_1, window_bounds = array<i64: 78, 50>}, {pipeline_mode = #tpu.pipeline_mode<synchronous>, transform_indices = @transform_2, window_bounds = array<i64: 1, 50>}, {pipeline_mode = #tpu.pipeline_mode<synchronous>, transform_indices = @transform_3, window_bounds = array<i64: 50, 25>}, {pipeline_mode = #tpu.pipeline_mode<synchronous>, transform_indices = @transform_4, window_bounds = array<i64: 1, 25>}, {pipeline_mode = #tpu.pipeline_mode<synchronous>, transform_indices = @transform_5, window_bounds = array<i64: 1, 25>}, {pipeline_mode = #tpu.pipeline_mode<synchronous>, transform_indices = @transform_6, window_bounds = array<i64: 1, 1>}, {transform_indices = @transform_7, window_bounds = array<i64: 1, 1, 128>}]} {
    %c0 = arith.constant 0 : index
    %c0_0 = arith.constant 0 : index
    %0 = vector.load %arg1[%c0, %c0_0] : memref<128x78xbf16, #tpu.memory_space<vmem>>, vector<128x78xbf16>
    %c0_1 = arith.constant 0 : index
    %c0_2 = arith.constant 0 : index
    %1 = vector.load %arg2[%c0_1, %c0_2] : memref<78x50xbf16, #tpu.memory_space<vmem>>, vector<78x50xbf16>
    %cst = arith.constant dense<0.000000e+00> : vector<128x50xf32>
    %2 = tpu.matmul %0, %1, %cst {dimension_numbers = #tpu.dot_dimension_numbers<[1], [0], [0], [1], [0, 0, 1, 1], [], []>} : vector<128x78xbf16>, vector<78x50xbf16>, vector<128x50xf32> -> vector<128x50xf32>
    %c0_3 = arith.constant 0 : index
    %c0_4 = arith.constant 0 : index
    %3 = vector.load %arg3[%c0_3, %c0_4] : memref<1x50xf32, #tpu.memory_space<vmem>>, vector<1x50xf32>
    %4 = vector.broadcast %3 : vector<1x50xf32> to vector<128x50xf32>
    %5 = arith.addf %2, %4 : vector<128x50xf32>
    %cst_5 = arith.constant 0.000000e+00 : f32
    %6 = vector.broadcast %cst_5 : f32 to vector<128x50xf32>
    %7 = arith.maximumf %5, %6 : vector<128x50xf32>
    %c0_6 = arith.constant 0 : index
    %c0_7 = arith.constant 0 : index
    %8 = vector.load %arg4[%c0_6, %c0_7] : memref<50x25xbf16, #tpu.memory_space<vmem>>, vector<50x25xbf16>
    %9 = arith.extf %8 : vector<50x25xbf16> to vector<50x25xf32>
    %cst_8 = arith.constant dense<0.000000e+00> : vector<128x25xf32>
    %10 = tpu.matmul %7, %9, %cst_8 {dimension_numbers = #tpu.dot_dimension_numbers<[1], [0], [0], [1], [0, 0, 1, 1], [], []>} : vector<128x50xf32>, vector<50x25xf32>, vector<128x25xf32> -> vector<128x25xf32>
    %c0_9 = arith.constant 0 : index
    %c0_10 = arith.constant 0 : index
    %11 = vector.load %arg5[%c0_9, %c0_10] : memref<1x25xf32, #tpu.memory_space<vmem>>, vector<1x25xf32>
    %12 = vector.broadcast %11 : vector<1x25xf32> to vector<128x25xf32>
    %13 = arith.addf %10, %12 : vector<128x25xf32>
    %cst_11 = arith.constant 0.000000e+00 : f32
    %14 = vector.broadcast %cst_11 : f32 to vector<128x25xf32>
    %15 = arith.maximumf %13, %14 : vector<128x25xf32>
    %c0_12 = arith.constant 0 : index
    %c0_13 = arith.constant 0 : index
    %16 = vector.load %arg6[%c0_12, %c0_13] : memref<1x25xbf16, #tpu.memory_space<vmem>>, vector<1x25xbf16>
    %17 = arith.extf %16 : vector<1x25xbf16> to vector<1x25xf32>
    %cst_14 = arith.constant dense<0.000000e+00> : vector<1x128xf32>
    %18 = tpu.matmul %17, %15, %cst_14 {dimension_numbers = #tpu.dot_dimension_numbers<[1], [1], [0], [0], [0, 0, 1, 0], [], []>} : vector<1x25xf32>, vector<128x25xf32>, vector<1x128xf32> -> vector<1x128xf32>
    %c0_15 = arith.constant 0 : index
    %c0_16 = arith.constant 0 : index
    %19 = vector.load %arg7[%c0_15, %c0_16] : memref<1x1xf32, #tpu.memory_space<vmem>>, vector<1x1xf32>
    %20 = vector.broadcast %19 : vector<1x1xf32> to vector<1x128xf32>
    %21 = arith.addf %18, %20 : vector<1x128xf32>
    %c0_17 = arith.constant 0 : index
    %c0_18 = arith.constant 0 : index
    %c0_19 = arith.constant 0 : index
    %22 = vector.load %arg8[%c0_17, %c0_18, %c0_19] : memref<1x1x128xf32, #tpu.memory_space<vmem>>, vector<1x1x128xf32>
    %23 = vector.shape_cast %22 : vector<1x1x128xf32> to vector<1x128xf32>
    %24 = vector.shape_cast %21 : vector<1x128xf32> to vector<1x1x128xf32>
    tpu.vector_store %arg8[%c0_17, %c0_18, %c0_19], %24 {strides = array<i32>} : memref<1x1x128xf32, #tpu.memory_space<vmem>>, vector<1x1x128xf32>,
    return
  }
  func.func @transform_0(%arg0: i32) -> (i32, i32) {
    %c0_i32 = arith.constant 0 : i32
    %c0_i32_0 = arith.constant 0 : i32
    return %arg0, %c0_i32 : i32, i32
  }
  func.func @transform_1(%arg0: i32) -> (i32, i32) {
    %c0_i32 = arith.constant 0 : i32
    %c0_i32_0 = arith.constant 0 : i32
    %c0_i32_1 = arith.constant 0 : i32
    return %c0_i32, %c0_i32_0 : i32, i32
  }
  func.func @transform_2(%arg0: i32) -> (i32, i32) {
    %c0_i32 = arith.constant 0 : i32
    %c0_i32_0 = arith.constant 0 : i32
    %c0_i32_1 = arith.constant 0 : i32
    return %c0_i32, %c0_i32_0 : i32, i32
  }
  func.func @transform_3(%arg0: i32) -> (i32, i32) {
    %c0_i32 = arith.constant 0 : i32
    %c0_i32_0 = arith.constant 0 : i32
    %c0_i32_1 = arith.constant 0 : i32
    return %c0_i32, %c0_i32_0 : i32, i32
  }
  func.func @transform_4(%arg0: i32) -> (i32, i32) {
    %c0_i32 = arith.constant 0 : i32
    %c0_i32_0 = arith.constant 0 : i32
    %c0_i32_1 = arith.constant 0 : i32
    return %c0_i32, %c0_i32_0 : i32, i32
  }
  func.func @transform_5(%arg0: i32) -> (i32, i32) {
    %c0_i32 = arith.constant 0 : i32
    %c0_i32_0 = arith.constant 0 : i32
    %c0_i32_1 = arith.constant 0 : i32
    return %c0_i32, %c0_i32_0 : i32, i32
  }
  func.func @transform_6(%arg0: i32) -> (i32, i32) {
    %c0_i32 = arith.constant 0 : i32
    %c0_i32_0 = arith.constant 0 : i32
    %c0_i32_1 = arith.constant 0 : i32
    return %c0_i32, %c0_i32_0 : i32, i32
  }
  func.func @transform_7(%arg0: i32) -> (i32, i32, i32) {
    %c0_i32 = arith.constant 0 : i32
    %c0_i32_0 = arith.constant 0 : i32
    %c0_i32_1 = arith.constant 0 : i32
    return %arg0, %c0_i32, %c0_i32_0 : i32, i32, i32
  }
}

</mosaic_0001>

<bundles_post_ra>
// kernel: tpu_custom_call.1
= control target key start
LH: loop header
LB: loop body
LE: loop exit
PB: predicated region body
PF: predicated region fallthrough
CT: control target
= control target key end

     0   :  { %s1144_s0 = inlined_call_operand.vmem [shape: bf16[128,78], index: 0, kind: input, shape index: {}]   ;;  %s1145_s1 = inlined_call_operand.vmem [shape: bf16[78,50], index: 1, kind: input, shape index: {}]   ;;  %s1146_s2 = inlined_call_operand.vmem [shape: f32[1,50], index: 2, kind: input, shape index: {}]   ;;  %s1147_s3 = inlined_call_operand.vmem [shape: bf16[50,25], index: 3, kind: input, shape index: {}]   ;;  %s1148_s4 = inlined_call_operand.vmem [shape: f32[1,25], index: 4, kind: input, shape index: {}]   ;;  %s1149_s5 = inlined_call_operand.vmem [shape: bf16[1,25], index: 5, kind: input, shape index: {}]   ;;  %s1150_s6 = inlined_call_operand.<no memory space> [shape: f32[1,1], index: 6, kind: input, shape index: {}]   ;;  %s1151_s7 = inlined_call_operand.hbm [shape: f32[1,1,128], index: 7, kind: output, shape index: {}]  }
   0x1   :  { %v12_v0 = vstv %s1150_s6 }
   0x2   :  { %13 = vst [vmem:[#allocation2] sm:$0x1] %v12_v0 }
   0x3   :  { %v932_v1 = vld [vmem:[%s1145_s1] sm:$0xff]   ;;  %v933_v2 = vld [vmem:[%s1145_s1 + $0x8] sm:$0xff]   ;;  %v934_v3 = vld [vmem:[%s1145_s1 + $0x10] sm:$0xff]   ;;  %vm132_vm0 = vcmask 637952   ;;  %vm157_vm1 = vcmask 1046528  }
   0x4   :  { %782 = vmatprep.subr.bf16.mxu0 %v932_v1  ;;  %v937_v4 = vld [vmem:[%s1144_s0] sm:$0xff]   ;;  %v935_v5 = vld [vmem:[%s1145_s1 + $0x18] sm:$0xff]   ;;  %v727_v8 = vld [vmem:[%s1147_s3 + $0x8] sm:$0xff]  }
   0x5   :  { %783 = vmatpush3.bf16.msra.mxu0 %v932_v1  ;;  %792 = vmatprep.mubr.msk.bf16.mxu0 %vm132_vm0, %v937_v4  ;;  %v936_v6 = vld [vmem:[%s1145_s1 + $0x20] sm:$0x7f]  }
   0x6   :  { %784 = vmatprep.subr.bf16.mxu0 %v933_v2  ;;  %v716_v7 = vld [vmem:[%s1147_s3] sm:$0xff]  }
   0x9   :  { %785 = vmatpush3.bf16.msra.mxu0 %v933_v2 }
   0xa   :  { %786 = vmatprep.subr.bf16.mxu0 %v934_v3 }
   0xd   :  { %787 = vmatpush3.bf16.msra.mxu0 %v934_v3 }
   0xe   :  { %788 = vmatprep.subr.bf16.mxu0 %v935_v5 }
   0xf   :  { %14 = vsyncpa [#allocation4], 0  ;;  %882 = vmatprep.subr.bf16.mxu1 %v716_v7  ;;  %v159_v9 = vsel %vm157_vm1, %v936_v6, 0  ;;  %v938_v10 = vld [vmem:[%s1144_s0 + $0x8] sm:$0xff]   ;;  %v939_v11 = vld [vmem:[%s1144_s0 + $0x10] sm:$0xff]   ;;  %vm344_vm2 = vcmask 1041408  }
  0x10   :  { %884 = vmatpush3.bf16.msra.mxu1 %v716_v7  ;;  %v940_v12 = vld [vmem:[%s1144_s0 + $0x18] sm:$0xff]   ;;  %v941_v13 = vld [vmem:[%s1144_s0 + $0x20] sm:$0xff]   ;;  %v942_v14 = vld [vmem:[%s1144_s0 + $0x28] sm:$0xff]   ;;  %vm295_vm3 = vcmask 408576   ;;  %vm970_vm4 = vmmov 0   ;;  %vm521_vm5 = vcmask 203776  }
  0x11   :  { %789 = vmatpush3.bf16.msra.mxu0 %v935_v5  ;;  %886 = vmatprep.subr.bf16.mxu1 %v727_v8  ;;  %v943_v15 = vld [vmem:[%s1144_s0 + $0x30] sm:$0xff]   ;;  %v944_v16 = vld [vmem:[%s1144_s0 + $0x38] sm:$0xff]   ;;  %v658_v20 = vld [vmem:[%s1146_s2] ss:$0 sm:$0xff]  ;;  %v969_v5 = vmov 0.0|0.0   ;;  %s973_s13 = smov [#allocation3]  }
  0x12   :  { %925 = vmatprep.subr.msk.bf16.mxu0 %vm157_vm1, %v936_v6  ;;  %v728_v17 = vld [vmem:[%s1147_s3 + $0x10] sm:$0xff]   ;;  %v280_v18 = vld [vmem:[%s1147_s3 + $0x18] sm:$0x1]  ;;  %v971_v6 = vmov 0.0   ;;  %v511_v7 = vld [vmem:[#allocation2] sm:$0x1] }
  0x13   :  { %v287_v19 = vunpack.c.l.bf16 %v280_v18  ;;  %vm1101_vm6 = vmpackc.low %vm521_vm5, %vm521_vm5  ;;  %s650_s14 = sshll.u32 %s973_s13, 4  ;;  %s651_s14 = int_to_ptr.vmem [resolvable:$true] %s650_s14 }
  0x14   :  { %888 = vmatpush3.bf16.msra.mxu1 %v727_v8  ;;  %v972_v8 = vmov 0   ;;  %s945_s15 = scalar_lea.vmem %s651_s14, 16  ;;  %s949_s16 = scalar_lea.vmem %s651_s14, 32 }
  0x15   :  { %791 = vmatpush3.bf16.msra.mxu0 %v159_v9  ;;  %890 = vmatprep.subr.bf16.mxu1 %v728_v17  ;;  %v680_v9 = vld [vmem:[%s1148_s4] ss:$0 sm:$0xff]  ;;  %p946_p0 = scmp.ne.s32.totalorder %s651_s14, %s945_s15  ;;  %p950_p1 = scmp.lt.s32.totalorder %s651_s14, %s651_s14 }
  0x16   :  { %931 = vset.pattern.permute.xlu0 %v972_v8  ;;  %p951_p2 = scmp.lt.s32.totalorder %s949_s16, %s945_s15 }
  0x17   :  { %514 = vperm.xlu0 %931, %v511_v7  }
  0x18   :  { %793 = vmatmul.mubr.msk.bf16.vlgmr.msra.gmra.mrb[0].mxu0 %vm132_vm0, %v938_v10  ;;  %892 = vmatpush3.bf16.msra.mxu1 %v728_v17  ;;  %p952_p3 = por %p951_p2, %p950_p1 }
  0x19   :  { %796 = vmatprep.mubr.msk.bf16.mxu0 %vm132_vm0, %v939_v11  ;;  %820 = vmatprep.subr.msk.mxu1 %vm344_vm2, %v287_v19 }
  0x1a   :  { %p953_p4 = pnand %p952_p3, %p946_p0 }
  0x1c   :  { %821 = vmatpush3.msk.msra.mxu1 %vm344_vm2, %v287_v19 }
  0x1d   :  { %893 = vmatprep.subr.bf16.mxu1 %v969_v5 }
  0x20   :  { %797 = vmatmul.mubr.msk.bf16.gmra.mrb[4].mxu0 %vm132_vm0, %v940_v12 }
  0x21   :  { %800 = vmatprep.mubr.msk.bf16.mxu0 %vm132_vm0, %v941_v13 }
  0x28   :  { %801 = vmatmul.mubr.msk.bf16.gmra.mrb[8].mxu0 %vm132_vm0, %v942_v14 }
  0x29   :  { %804 = vmatprep.mubr.msk.bf16.mxu0 %vm132_vm0, %v943_v15 }
  0x30   :  { %805 = vmatmul.mubr.msk.bf16.gmra.mrb[12].mxu0 %vm132_vm0, %v944_v16 }
  0xeb   :  { %v794_v21 = vpop.f32.mrb[0].mxu0 }
  0xec   :  { %v195_v22 = vpop.f32.mrb[1].mxu0  ;;  %v204_v25 = vadd.f32 %v794_v21, %v658_v20 }
  0xed   :  { %v196_v23 = vadd.f32 %v658_v20, %v195_v22  ;;  %v795_v24 = vpop.f32.mrb[2].mxu0 }
  0xee   :  { %v198_v26 = vpop.f32.mrb[3].mxu0  ;;  %v207_v29 = vadd.f32 %v795_v24, %v658_v20  ;;  %v260_v31 = vmax.f32 %v204_v25, 0.0 }
  0xef   :  { %v258_v27 = vmax.f32 %v196_v23, 0.0  ;;  %v199_v28 = vadd.f32 %v658_v20, %v198_v26 }
  0xf0   :  { %v261_v35 = vmax.f32 %v207_v29, 0.0 }
  0xf1   :  { %v259_v30 = vmax.f32 %v199_v28, 0.0  ;;  %822 = vmatprep.mubr.msk.f32.mxu1 %vm295_vm3, %v258_v27 }
  0xf3   :  { %v798_v32 = vpop.f32.mrb[4].mxu0  ;;  %823 = vmatmul.mubr.msk.f32.vlgmr.msra.gmra.mrb[0].mxu1 %vm295_vm3, %v259_v30 }
  0xf4   :  { %v220_v33 = vadd.f32 %v798_v32, %v658_v20  ;;  %v211_v34 = vpop.f32.mrb[5].mxu0  ;;  %825 = vmatprep.mubr.msk.f32.mxu1 %vm295_vm3, %v260_v31 }
  0xf5   :  { %v212_v36 = vadd.f32 %v658_v20, %v211_v34  ;;  %v799_v37 = vpop.f32.mrb[6].mxu0 }
  0xf6   :  { %v214_v38 = vpop.f32.mrb[7].mxu0  ;;  %v223_v40 = vadd.f32 %v799_v37, %v658_v20  ;;  %v264_v42 = vmax.f32 %v220_v33, 0.0 }
  0xf7   :  { %v262_v39 = vmax.f32 %v212_v36, 0.0  ;;  %v215_v41 = vadd.f32 %v658_v20, %v214_v38  ;;  %826 = vmatmul.mubr.msk.f32.gmra.mrb[2].mxu1 %vm295_vm3, %v261_v35 }
  0xf8   :  { %v265_v44 = vmax.f32 %v223_v40, 0.0 }
  0xf9   :  { %v263_v43 = vmax.f32 %v215_v41, 0.0  ;;  %828 = vmatprep.mubr.msk.f32.mxu1 %vm295_vm3, %v262_v39 }
  0xfb   :  { %829 = vmatmul.mubr.msk.f32.gmra.mrb[4].mxu1 %vm295_vm3, %v263_v43  ;;  %v802_v45 = vpop.f32.mrb[8].mxu0 }
  0xfc   :  { %831 = vmatprep.mubr.msk.f32.mxu1 %vm295_vm3, %v264_v42  ;;  %v236_v46 = vadd.f32 %v802_v45, %v658_v20  ;;  %v227_v47 = vpop.f32.mrb[9].mxu0 }
  0xfd   :  { %v228_v48 = vadd.f32 %v658_v20, %v227_v47  ;;  %v803_v49 = vpop.f32.mrb[10].mxu0 }
  0xfe   :  { %v230_v50 = vpop.f32.mrb[11].mxu0  ;;  %v239_v52 = vadd.f32 %v803_v49, %v658_v20  ;;  %v268_v54 = vmax.f32 %v236_v46, 0.0 }
  0xff   :  { %832 = vmatmul.mubr.msk.f32.gmra.mrb[6].mxu1 %vm295_vm3, %v265_v44  ;;  %v266_v51 = vmax.f32 %v228_v48, 0.0  ;;  %v231_v53 = vadd.f32 %v658_v20, %v230_v50 }
 0x100   :  { %v269_v56 = vmax.f32 %v239_v52, 0.0 }
 0x101   :  { %v267_v55 = vmax.f32 %v231_v53, 0.0  ;;  %834 = vmatprep.mubr.msk.f32.mxu1 %vm295_vm3, %v266_v51 }
 0x103   :  { %835 = vmatmul.mubr.msk.f32.gmra.mrb[8].mxu1 %vm295_vm3, %v267_v55  ;;  %v806_v57 = vpop.f32.mrb[12].mxu0 }
 0x104   :  { %837 = vmatprep.mubr.msk.f32.mxu1 %vm295_vm3, %v268_v54  ;;  %v252_v58 = vadd.f32 %v806_v57, %v658_v20  ;;  %v243_v59 = vpop.f32.mrb[13].mxu0 }
 0x105   :  { %v244_v60 = vadd.f32 %v658_v20, %v243_v59  ;;  %v807_v61 = vpop.f32.mrb[14].mxu0 }
 0x106   :  { %v246_v62 = vpop.f32.mrb[15].mxu0  ;;  %v255_v0 = vadd.f32 %v807_v61, %v658_v20  ;;  %v272_v2 = vmax.f32 %v252_v58, 0.0 }
 0x107   :  { %838 = vmatmul.mubr.msk.f32.gmra.mrb[10].mxu1 %vm295_vm3, %v269_v56  ;;  %v270_v63 = vmax.f32 %v244_v60, 0.0  ;;  %v247_v1 = vadd.f32 %v658_v20, %v246_v62 }
 0x108   :  { %v273_v4 = vmax.f32 %v255_v0, 0.0 }
 0x109   :  { %v271_v3 = vmax.f32 %v247_v1, 0.0  ;;  %840 = vmatprep.mubr.msk.f32.mxu1 %vm295_vm3, %v270_v63 }
 0x10b   :  { %841 = vmatmul.mubr.msk.f32.gmra.mrb[12].mxu1 %vm295_vm3, %v271_v3  ;;  %v509_v3 = vld [vmem:[%s1149_s5] sm:$0x1] }
 0x10c   :  { %843 = vmatprep.mubr.msk.f32.mxu1 %vm295_vm3, %v272_v2 }
 0x10f   :  { %844 = vmatmul.mubr.msk.f32.gmra.mrb[14].mxu1 %vm295_vm3, %v273_v4  ;;  %v510_v4 = vunpack.c.l.bf16 %v509_v3 }
 0x110   :  { %878 = vmatprep.mubr.msk.f32.mxu1 %vm970_vm4, %v971_v6  ;;  %v517_v6 = vlaneseq }
 0x112   :  { %v518_v7 = vshrl.u32 %v517_v6, 7 }
 0x114   :  { %v519_v8 = vsub.s32 0, %v518_v7 }
 0x1c6   :  { %v824_v10 = vpop.f32.mrb[0].mxu1 }
 0x1c7   :  { %v420_v11 = vadd.f32 %v824_v10, %v680_v9  ;;  %v414_v12 = vpop.f32.mrb[1].mxu1 }
 0x1c8   :  { %v415_v13 = vadd.f32 %v680_v9, %v414_v12 }
 0x1c9   :  { %v494_v14 = vmax.f32 %v420_v11, 0.0 }
 0x1ca   :  { %v493_v15 = vmax.f32 %v415_v13, 0.0  ;;  %v827_v16 = vpop.f32.mrb[2].mxu1 }
 0x1cb   :  { %v430_v17 = vadd.f32 %v827_v16, %v680_v9  ;;  %v424_v18 = vpop.f32.mrb[3].mxu1 }
 0x1cc   :  { %v894_v20 = vpack.c.bf16 %v494_v14, %v493_v15  ;;  %v425_v21 = vadd.f32 %v680_v9, %v424_v18 }
 0x1cd   :  { %v496_v22 = vmax.f32 %v430_v17, 0.0 }
 0x1ce   :  { %v495_v23 = vmax.f32 %v425_v21, 0.0  ;;  %896 = vmatpush3.bf16.xpose.msk.msra.mxu1 %vm1101_vm6, %v894_v20  ;;  %v830_v24 = vpop.f32.mrb[4].mxu1 }
 0x1cf   :  { %v440_v25 = vadd.f32 %v830_v24, %v680_v9  ;;  %v434_v26 = vpop.f32.mrb[5].mxu1  ;;  %897 = vmatprep.subr.bf16.mxu1 %v969_v5 }
 0x1d0   :  { %v898_v27 = vpack.c.bf16 %v496_v22, %v495_v23  ;;  %v435_v28 = vadd.f32 %v680_v9, %v434_v26 }
 0x1d1   :  { %v498_v29 = vmax.f32 %v440_v25, 0.0 }
 0x1d2   :  { %v497_v30 = vmax.f32 %v435_v28, 0.0  ;;  %v833_v31 = vpop.f32.mrb[6].mxu1 }
 0x1d3   :  { %v450_v32 = vadd.f32 %v833_v31, %v680_v9  ;;  %v444_v33 = vpop.f32.mrb[7].mxu1 }
 0x1d4   :  { %v902_v34 = vpack.c.bf16 %v498_v29, %v497_v30  ;;  %v445_v35 = vadd.f32 %v680_v9, %v444_v33 }
 0x1d5   :  { %v500_v36 = vmax.f32 %v450_v32, 0.0 }
 0x1d6   :  { %v499_v37 = vmax.f32 %v445_v35, 0.0  ;;  %900 = vmatpush3.bf16.xpose.msk.msra.mxu1 %vm1101_vm6, %v898_v27  ;;  %v836_v38 = vpop.f32.mrb[8].mxu1 }
 0x1d7   :  { %901 = vmatprep.subr.bf16.mxu1 %v969_v5  ;;  %v460_v39 = vadd.f32 %v836_v38, %v680_v9  ;;  %v454_v40 = vpop.f32.mrb[9].mxu1 }
 0x1d8   :  { %v906_v41 = vpack.c.bf16 %v500_v36, %v499_v37  ;;  %v455_v42 = vadd.f32 %v680_v9, %v454_v40 }
 0x1d9   :  { %v502_v43 = vmax.f32 %v460_v39, 0.0 }
 0x1da   :  { %v501_v44 = vmax.f32 %v455_v42, 0.0  ;;  %v839_v45 = vpop.f32.mrb[10].mxu1 }
 0x1db   :  { %v470_v46 = vadd.f32 %v839_v45, %v680_v9  ;;  %v464_v47 = vpop.f32.mrb[11].mxu1 }
 0x1dc   :  { %v910_v48 = vpack.c.bf16 %v502_v43, %v501_v44  ;;  %v465_v49 = vadd.f32 %v680_v9, %v464_v47 }
 0x1dd   :  { %v504_v50 = vmax.f32 %v470_v46, 0.0 }
 0x1de   :  { %904 = vmatpush3.bf16.xpose.msk.msra.mxu1 %vm1101_vm6, %v902_v34  ;;  %v503_v51 = vmax.f32 %v465_v49, 0.0  ;;  %v842_v52 = vpop.f32.mrb[12].mxu1 }
 0x1df   :  { %905 = vmatprep.subr.bf16.mxu1 %v969_v5  ;;  %v480_v53 = vadd.f32 %v842_v52, %v680_v9  ;;  %v474_v54 = vpop.f32.mrb[13].mxu1 }
 0x1e0   :  { %v914_v55 = vpack.c.bf16 %v504_v50, %v503_v51  ;;  %v475_v56 = vadd.f32 %v680_v9, %v474_v54 }
 0x1e1   :  { %v506_v57 = vmax.f32 %v480_v53, 0.0 }
 0x1e2   :  { %v505_v58 = vmax.f32 %v475_v56, 0.0  ;;  %v845_v59 = vpop.f32.mrb[14].mxu1 }
 0x1e3   :  { %v490_v60 = vadd.f32 %v845_v59, %v680_v9  ;;  %v484_v61 = vpop.f32.mrb[15].mxu1 }
 0x1e4   :  { %v918_v62 = vpack.c.bf16 %v506_v57, %v505_v58  ;;  %v485_v63 = vadd.f32 %v680_v9, %v484_v61  ;;  %v515_v9 = vpop.permute.xlu0 %514 }
 0x1e5   :  { %v508_v0 = vmax.f32 %v490_v60, 0.0  ;;  %v520_v10 = vrot.slane %v515_v9, %v519_v8 }
 0x1e6   :  { %908 = vmatpush3.bf16.xpose.msk.msra.mxu1 %vm1101_vm6, %v906_v41  ;;  %v507_v1 = vmax.f32 %v485_v63, 0.0 }
 0x1e7   :  { %909 = vmatprep.subr.bf16.mxu1 %v969_v5 }
 0x1e8   :  { %v922_v2 = vpack.c.bf16 %v508_v0, %v507_v1 }
 0x1ee   :  { %912 = vmatpush3.bf16.xpose.msk.msra.mxu1 %vm1101_vm6, %v910_v48 }
 0x1ef   :  { %913 = vmatprep.subr.bf16.mxu1 %v969_v5 }
 0x1f6   :  { %916 = vmatpush3.bf16.xpose.msk.msra.mxu1 %vm1101_vm6, %v914_v55 }
 0x1f7   :  { %917 = vmatprep.subr.bf16.mxu1 %v969_v5 }
 0x1fe   :  { %920 = vmatpush3.bf16.xpose.msk.msra.mxu1 %vm1101_vm6, %v918_v62 }
 0x1ff   :  { %921 = vmatprep.subr.bf16.mxu1 %v969_v5 }
 0x206   :  { %924 = vmatpush3.bf16.xpose.msk.msra.mxu1 %vm1101_vm6, %v922_v2 }
 0x20d   :  { %879 = vmatmul.mubr.msk.f32.vlgmr.msra.gmra.mrb[16].mxu1 %vm521_vm5, %v510_v4 }
 0x2e0   :  { %v639_v11 = vpop.f32.mrb[16].mxu1 }
 0x2e1   :  { %v640_v12 = vadd.f32 %v639_v11, %v520_v10  ;;  %v880_v5 = vpop.f32.mrb[17].mxu1 }
 0x2e3   :  { %643 = vst [vmem:[#allocation3] sm:$0x1] %v640_v12 }
 0x2e4   :  { %956 = shalt.err (!%p953_p4)
}
 0x2e5   :  { %s957_s18 = scalar_lea.hbm %s1151_s7, 16 }
 0x2e6   :  { %p958_p5 = scmp.ne.s32.totalorder %s1151_s7, %s957_s18  ;;  %p961_p6 = scmp.lt.u32.totalorder %s957_s18, %s1151_s7 }
 0x2e8   :  { %p963_p7 = pnand %p961_p6, %p958_p5 }
 0x2ea   :  { %966 = shalt.err (!%p963_p7)
}
 0x2eb   :  { %653 = dma.vmem_to_hbm [thread:$0]  %s651_s14, 16, %s1151_s7, [#allocation4]  }
 0x2ec   :  { %967 = dma.done.wait [#allocation4], 16  }
 0x2ed   :  { %968 = vsyncadd [#allocation4], 4294967280 }
 0x2ee   :  { %657 = vsyncpa [#allocation4], 1 }

</bundles_post_ra>
